<compile_context>
chip_gen: v6e
topology: v6e:2x2x1
jax: 0.10.0
libtpu: 0.0.40
codegen_flags: <defaults>
</compile_context>

<pallas_src>
import functools

import jax
import jax.numpy as jnp
from jax.experimental import pallas as pl
from jax.experimental.pallas import tpu as pltpu


def _ce_ls_kernel(logits_ref, target_ref, partial_ref,
                  *, n_rows, tile_n, classes, ls_factor, ignore_index):
    """One grid step: reduce a (tile_n, C) logits tile to a (1, 8, 128) partial."""
    i = pl.program_id(0)
    complement = 1.0 - ls_factor
    uniform = ls_factor / classes

    x = logits_ref[...].astype(jnp.float32)            # (TN, C) — all math in f32
    t = target_ref[...]                                # (TN, 1) int32

    # Rows past the real batch (padded tail block of the grid) may contain
    # arbitrary HBM/VMEM contents.  Zero them BEFORE the exp/log path so the
    # guard never depends on select lowering not propagating NaN/Inf.
    row_idx = jax.lax.broadcasted_iota(jnp.int32, t.shape, 0) + i * tile_n
    in_range = row_idx < n_rows                        # (TN, 1) bool
    x = jnp.where(in_range, x, 0.0)

    # Row-wise stabilized log-sum-exp.
    row_max = jnp.max(x, axis=1, keepdims=True)
    shifted = x - row_max                              # (TN, C)
    lse = jnp.log(jnp.sum(jnp.exp(shifted), axis=1, keepdims=True))  # (TN, 1)

    # Merged smoothing reduction (single XLU pass, single read of `shifted`):
    #   per_row = -sum(log_softmax * smooth)
    #           = lse - sum(shifted * (ls/C + (1-ls) * onehot))     [sum(smooth)=1]
    col = jax.lax.broadcasted_iota(jnp.int32, x.shape, 1)
    w = jnp.where(col == t, complement + uniform, uniform)
    per_row = lse - jnp.sum(shifted * w, axis=1, keepdims=True)      # (TN, 1)

    # Valid rows: inside the real batch and not ignore_index.
    valid = in_range & (t != ignore_index)
    psum = jnp.sum(jnp.where(valid, per_row, 0.0))
    pcnt = jnp.sum(valid.astype(jnp.float32))

    # Lane-dense per-block partial: sublane 0 = loss sum, sublane 1 = valid count.
    row = jax.lax.broadcasted_iota(jnp.int32, partial_ref.shape, 1)
    partial_ref[...] = jnp.where(row == 0, psum, jnp.where(row == 1, pcnt, 0.0))


def _vmem_targets():
    """Returns (scoped vmem limit to request, tile-sizing budget), generation-aware."""
    try:
        physical = int(pltpu.get_tpu_info().vmem_capacity_bytes)
    except Exception:
        physical = 64 * 1024 * 1024            # conservative fallback (v7x-sized)
    if physical >= 96 * 1024 * 1024:           # v5e / v6e: 128 MiB physical per TC
        scoped = 64 * 1024 * 1024
    else:                                      # v7x: 64 MiB physical per TC
        scoped = 44 * 1024 * 1024
    budget = (scoped * 3) // 4                 # headroom for compiler temps/spills
    return scoped, budget


def _auto_tile_n(n_rows, n_classes, itemsize, budget):
    # Per tile row (default double-buffered auto-pipeline):
    #   * logits: 2 input buffers                          -> 2 * itemsize * C bytes
    #   * in-kernel f32 full-tile temporaries (~4 live)    -> 16 * C bytes
    #   * target: (TN, 1) int32 lane-padded to 128 lanes,
    #     double-buffered                                  -> 2 * 128 * 4 = 1024 bytes
    bytes_per_row = n_classes * (2 * itemsize + 16) + 1024
    cap = budget // bytes_per_row
    cap = max(8, min(8192, (cap // 8) * 8))
    # TODO(synk): for very wide vocabularies (C so large that even ~8 rows blow the
    # budget, e.g. 200k+ classes on v7x's 64 MiB), add a class-axis grid dimension
    # with online (flash-style) LSE accumulation instead of degenerate row tiles.
    return int(min(cap, n_rows))


def ce_loss_with_ls(logits, target, *, classes, ls_factor=0.1, ignore_index=-1,
                    tile_n=None):
    N, C = logits.shape
    assert C == classes
    itemsize = jnp.dtype(logits.dtype).itemsize
    scoped_vmem, budget = _vmem_targets()
    if tile_n is None:
        tile_n = _auto_tile_n(N, C, itemsize, budget)
    tile_n = int(min(tile_n, N))
    grid = pl.cdiv(N, tile_n)

    target2d = target.reshape(N, 1).astype(jnp.int32)

    kernel = functools.partial(
        _ce_ls_kernel,
        n_rows=N, tile_n=tile_n, classes=classes,
        ls_factor=ls_factor, ignore_index=ignore_index)

    cost = pl.CostEstimate(
        flops=int(6 * N * C),
        transcendentals=int(N * C),
        bytes_accessed=int(N * C * itemsize + N * 4 + grid * 8 * 128 * 4))

    partials = pl.pallas_call(
        kernel,
        out_shape=jax.ShapeDtypeStruct((grid, 8, 128), jnp.float32),
        grid_spec=pltpu.PrefetchScalarGridSpec(
            num_scalar_prefetch=0,
            grid=(grid,),
            in_specs=[
                pl.BlockSpec((tile_n, C), lambda i: (i, 0)),   # logits tile
                pl.BlockSpec((tile_n, 1), lambda i: (i, 0)),   # target tile
            ],
            out_specs=pl.BlockSpec((1, 8, 128), lambda i: (i, 0, 0)),
        ),
        compiler_params=pltpu.CompilerParams(
            # Independent per-block partials -> the row axis can be sharded
            # across both v7x TensorCores.
            # TODO(synk): if an xprof trace shows only one v7x TC active, switch
            # this axis to pltpu.CORE_PARALLEL (the per-block output design
            # already makes that safe).
            dimension_semantics=("parallel",),
            vmem_limit_bytes=scoped_vmem),
        cost_estimate=cost,
    )(logits, target2d)

    # Tiny cross-block reduction + mean in plain JAX (better f32 accumulation).
    total = jnp.sum(partials[:, 0, 0])
    count = jnp.sum(partials[:, 1, 0])
    # NOTE: an all-ignored batch intentionally returns NaN (0/0), matching
    # torch's `.mean()` over an empty selection in the original module.
    return total / count


def _reference(logits, target, *, classes, ls_factor=0.1, ignore_index=-1):
    # Pure-JAX reference mirroring the torch module.
    complement = 1.0 - ls_factor
    oh = jax.nn.one_hot(target, classes, dtype=jnp.float32)
    smooth = oh * complement + ls_factor / classes
    mask = target != ignore_index
    logs = jax.nn.log_softmax(logits.astype(jnp.float32), axis=1)
    per_row = -jnp.sum(logs * smooth, axis=1)
    return jnp.sum(per_row * mask) / jnp.sum(mask)


if __name__ == "__main__":
    key = jax.random.PRNGKey(0)
    k1, k2, k3, k4 = jax.random.split(key, 4)

    # --- Case 1/2: f32, batch=37 (deliberately NOT a multiple of the tile), 128 classes.
    N, C = 37, 128
    logits = jax.random.normal(k1, (N, C), dtype=jnp.float32)
    target = jax.random.randint(k2, (N,), 0, C, dtype=jnp.int32)
    target = target.at[5].set(-1)      # one ignored row exercises the mask path

    ref = _reference(logits, target, classes=C, ls_factor=0.1, ignore_index=-1)

    # 1) explicit small tile -> multi-block grid with a masked tail block
    loss_tiled = ce_loss_with_ls(logits, target, classes=C, ls_factor=0.1,
                                 ignore_index=-1, tile_n=16)
    jax.block_until_ready(loss_tiled)
    assert jnp.allclose(loss_tiled, ref, rtol=1e-5, atol=1e-5), (loss_tiled, ref)

    # 2) auto-sized tile -> single full-array block
    loss_auto = ce_loss_with_ls(logits, target, classes=C, ls_factor=0.1,
                                ignore_index=-1)
    jax.block_until_ready(loss_auto)
    assert jnp.allclose(loss_auto, ref, rtol=1e-5, atol=1e-5), (loss_auto, ref)

    # --- Case 3: bf16 logits (in-kernel f32 cast path), batch=64, 256 classes.
    N2, C2 = 64, 256
    logits_bf = jax.random.normal(k3, (N2, C2), dtype=jnp.float32).astype(jnp.bfloat16)
    target2 = jax.random.randint(k4, (N2,), 0, C2, dtype=jnp.int32)
    target2 = target2.at[0].set(-1)

    ref2 = _reference(logits_bf, target2, classes=C2, ls_factor=0.1, ignore_index=-1)
    loss_bf = ce_loss_with_ls(logits_bf, target2, classes=C2, ls_factor=0.1,
                              ignore_index=-1)
    jax.block_until_ready(loss_bf)
    assert jnp.allclose(loss_bf, ref2, rtol=1e-4, atol=1e-4), (loss_bf, ref2)

    print("KERNEL_OK")
</pallas_src>

<mosaic_0001>
module attributes {stable_mosaic.version = 11 : i64} {
  func.func @_ce_ls_kernel(%arg0: i32, %arg1: memref<16x128xf32, #tpu.memory_space<vmem>>, %arg2: memref<16x1xi32, #tpu.memory_space<vmem>>, %arg3: memref<1x8x128xf32, #tpu.memory_space<vmem>>) attributes {dimension_semantics = [#tpu.dimension_semantics<parallel>], iteration_bounds = array<i64: 3>, scalar_prefetch = 0 : i64, scratch_operands = 0 : i64, tpu.core_type = #tpu.core_type<tc>, window_params = [{transform_indices = @transform_0, window_bounds = array<i64: 16, 128>}, {transform_indices = @transform_1, window_bounds = array<i64: 16, 1>}, {transform_indices = @transform_2, window_bounds = array<i64: 1, 8, 128>}]} {
    %c0 = arith.constant 0 : index
    %c0_0 = arith.constant 0 : index
    %0 = vector.load %arg1[%c0, %c0_0] : memref<16x128xf32, #tpu.memory_space<vmem>>, vector<16x128xf32>
    %c0_1 = arith.constant 0 : index
    %c0_2 = arith.constant 0 : index
    %1 = vector.load %arg2[%c0_1, %c0_2] : memref<16x1xi32, #tpu.memory_space<vmem>>, vector<16x1xi32>
    %2 = tpu.iota {dimensions = array<i32: 0>} : vector<16x1xi32>
    %c16_i32 = arith.constant 16 : i32
    %3 = arith.muli %arg0, %c16_i32 : i32
    %4 = vector.broadcast %3 : i32 to vector<16x1xi32>
    %5 = arith.addi %2, %4 : vector<16x1xi32>
    %c37_i32 = arith.constant 37 : i32
    %6 = vector.broadcast %c37_i32 : i32 to vector<16x1xi32>
    %7 = arith.cmpi slt, %5, %6 : vector<16x1xi32>
    %cst = arith.constant 0.000000e+00 : f32
    %8 = vector.shape_cast %7 : vector<16x1xi1> to vector<16x1xi1>
    %9 = vector.broadcast %8 : vector<16x1xi1> to vector<16x128xi1>
    %10 = vector.broadcast %cst : f32 to vector<16x128xf32>
    %11 = arith.select %9, %0, %10 : vector<16x128xi1>, vector<16x128xf32>
    %cst_3 = arith.constant dense<0xFF800000> : vector<16xf32>
    %12 = vector.multi_reduction <maximumf>, %11, %cst_3 [1] : vector<16x128xf32> to vector<16xf32>
    %13 = vector.shape_cast %12 : vector<16xf32> to vector<16x1xf32>
    %14 = vector.broadcast %13 : vector<16x1xf32> to vector<16x128xf32>
    %15 = arith.subf %11, %14 : vector<16x128xf32>
    %16 = math.exp %15 : vector<16x128xf32>
    %cst_4 = arith.constant dense<0.000000e+00> : vector<16xf32>
    %17 = vector.multi_reduction <add>, %16, %cst_4 [1] : vector<16x128xf32> to vector<16xf32>
    %18 = vector.shape_cast %17 : vector<16xf32> to vector<16x1xf32>
    %19 = math.log %18 : vector<16x1xf32>
    %20 = tpu.iota {dimensions = array<i32: 1>} : vector<16x128xi32>
    %21 = vector.broadcast %1 : vector<16x1xi32> to vector<16x128xi32>
    %22 = arith.cmpi eq, %20, %21 : vector<16x128xi32>
    %cst_5 = arith.constant 0.900781273 : f32
    %cst_6 = arith.constant 7.812500e-04 : f32
    %23 = vector.broadcast %cst_5 : f32 to vector<16x128xf32>
    %24 = vector.broadcast %cst_6 : f32 to vector<16x128xf32>
    %25 = arith.select %22, %23, %24 : vector<16x128xi1>, vector<16x128xf32>
    %26 = arith.mulf %15, %25 : vector<16x128xf32>
    %cst_7 = arith.constant dense<0.000000e+00> : vector<16xf32>
    %27 = vector.multi_reduction <add>, %26, %cst_7 [1] : vector<16x128xf32> to vector<16xf32>
    %28 = vector.shape_cast %27 : vector<16xf32> to vector<16x1xf32>
    %29 = arith.subf %19, %28 : vector<16x1xf32>
    %c-1_i32 = arith.constant -1 : i32
    %30 = vector.broadcast %c-1_i32 : i32 to vector<16x1xi32>
    %31 = arith.cmpi ne, %1, %30 : vector<16x1xi32>
    %32 = arith.andi %7, %31 : vector<16x1xi1>
    %cst_8 = arith.constant 0.000000e+00 : f32
    %33 = vector.broadcast %cst_8 : f32 to vector<16x1xf32>
    %34 = arith.select %32, %29, %33 : vector<16x1xi1>, vector<16x1xf32>
    %35 = vector.shape_cast %34 : vector<16x1xf32> to vector<1x16x1xf32>
    %cst_9 = arith.constant dense<0.000000e+00> : vector<1xf32>
    %36 = vector.multi_reduction <add>, %35, %cst_9 [1, 2] : vector<1x16x1xf32> to vector<1xf32>
    %37 = vector.shape_cast %36 : vector<1xf32> to vector<1x1x1xf32>
    %38 = vector.extract %37[0, 0, 0] : f32 from vector<1x1x1xf32>
    %39 = arith.extui %32 : vector<16x1xi1> to vector<16x1xi32>
    %40 = arith.sitofp %39 : vector<16x1xi32> to vector<16x1xf32>
    %41 = vector.shape_cast %40 : vector<16x1xf32> to vector<1x16x1xf32>
    %cst_10 = arith.constant dense<0.000000e+00> : vector<1xf32>
    %42 = vector.multi_reduction <add>, %41, %cst_10 [1, 2] : vector<1x16x1xf32> to vector<1xf32>
    %43 = vector.shape_cast %42 : vector<1xf32> to vector<1x1x1xf32>
    %44 = vector.extract %43[0, 0, 0] : f32 from vector<1x1x1xf32>
    %45 = tpu.iota {dimensions = array<i32: 1>} : vector<1x8x128xi32>
    %c0_i32 = arith.constant 0 : i32
    %46 = vector.broadcast %c0_i32 : i32 to vector<1x8x128xi32>
    %47 = arith.cmpi eq, %45, %46 : vector<1x8x128xi32>
    %c1_i32 = arith.constant 1 : i32
    %48 = vector.broadcast %c1_i32 : i32 to vector<1x8x128xi32>
    %49 = arith.cmpi eq, %45, %48 : vector<1x8x128xi32>
    %cst_11 = arith.constant 0.000000e+00 : f32
    %50 = vector.broadcast %44 : f32 to vector<1x8x128xf32>
    %51 = vector.broadcast %cst_11 : f32 to vector<1x8x128xf32>
    %52 = arith.select %49, %50, %51 : vector<1x8x128xi1>, vector<1x8x128xf32>
    %53 = vector.broadcast %38 : f32 to vector<1x8x128xf32>
    %54 = arith.select %47, %53, %52 : vector<1x8x128xi1>, vector<1x8x128xf32>
    %c0_12 = arith.constant 0 : index
    %c0_13 = arith.constant 0 : index
    %c0_14 = arith.constant 0 : index
    %55 = vector.load %arg3[%c0_12, %c0_13, %c0_14] : memref<1x8x128xf32, #tpu.memory_space<vmem>>, vector<1x8x128xf32>
    tpu.vector_store %arg3[%c0_12, %c0_13, %c0_14], %54 {strides = array<i32>} : memref<1x8x128xf32, #tpu.memory_space<vmem>>, vector<1x8x128xf32>,
    return
  }
  func.func @transform_0(%arg0: i32) -> (i32, i32) {
    %c0_i32 = arith.constant 0 : i32
    %c0_i32_0 = arith.constant 0 : i32
    return %arg0, %c0_i32 : i32, i32
  }
  func.func @transform_1(%arg0: i32) -> (i32, i32) {
    %c0_i32 = arith.constant 0 : i32
    %c0_i32_0 = arith.constant 0 : i32
    return %arg0, %c0_i32 : i32, i32
  }
  func.func @transform_2(%arg0: i32) -> (i32, i32, i32) {
    %c0_i32 = arith.constant 0 : i32
    %c0_i32_0 = arith.constant 0 : i32
    %c0_i32_1 = arith.constant 0 : i32
    return %arg0, %c0_i32, %c0_i32_0 : i32, i32, i32
  }
}

</mosaic_0001>

<bundles_post_ra>
// kernel: tpu_custom_call.1
= control target key start
LH: loop header
LB: loop body
LE: loop exit
PB: predicated region body
PF: predicated region fallthrough
CT: control target
= control target key end

     0   :  { %7 = vsyncpa [#allocation3], 0  ;;  %s667_s0 = inlined_call_operand.vmem [shape: f32[37,128], index: 0, kind: input, shape index: {}]   ;;  %s668_s1 = inlined_call_operand.vmem [shape: s32[37,1], index: 1, kind: input, shape index: {}]   ;;  %s669_s2 = inlined_call_operand.hbm [shape: f32[3,8,128], index: 2, kind: output, shape index: {}]  }
   0x1   :  { %9 = vsyncpa [#allocation3 + $0x1], 0  ;;  %s543_s9 = smov 0   ;;  %s545_s10 = smov 0  }
   0x2   :  { %s547_s11 = smov 0   ;;  %s549_s12 = smov 0  }
   0x3 LB: > { %s564_s13 = sadd.s32 4294967295, %s522_s12   ;;  %s390_s14 = sadd.s32 4294967294, %s522_s12   ;;  %s522_s12 = sphi %s549_s12, %s679_s12   ;;  %s518_s11 = sphi %s547_s11, %s678_s11   ;;  %s514_s10 = sphi %s545_s10, %s677_s10   ;;  %s510_s9 = sphi %s543_s9, %s676_s9  }
   0x4   : > { %s568_s15 = sadd.s32 1, %s522_s12   ;;  %s74_s16 = sadd.s32 1, %s518_s11 }
   0x5   : > { %s71_s17 = ssub.s32 %s522_s12, %s568_s15  ;;  %p84_p0 = scmp.ne.s32.totalorder %s518_s11, %s514_s10 }
   0x6   : > { %p72_p1 = scmp.eq.s32.totalorder %s71_s17, 0  ;;  %p85_p2 = scmp.eq.s32.totalorder %s564_s13, 2 }
   0x7   : > { %p90_p3 = scmp.ne.s32.totalorder %s514_s10, %s510_s9  ;;  %p91_p4 = scmp.eq.s32.totalorder %s390_s14, 2 }
   0x8   : > { %s579_s18 = scalar_select %p72_p1, %s518_s11, %s74_s16  }
   0x9   : > { %p581_p5 = por %p85_p2, %p84_p0  ;;  %p585_p6 = por %p91_p4, %p90_p3 }
   0xa   : > { %p393_p7 = scmp.ge.s32.totalorder %s522_s12, 1  ;;  %p143_p8 = scmp.lt.s32.totalorder %s522_s12, 4 }
   0xc   : > { %p144_p9 = pnand %p393_p7, %p143_p8 }
   0xd   : > { %s395_s21 = sshll.u32 (!%p144_p9), %s564_s13, 1  ;;  %s399_s22 = sshll.u32 (!%p144_p9), %s564_s13, 4 }
   0xe   : > { %147 = sbr.rel (%p144_p9) target bundleno = 567 (0x237), region = 28  ;;  %p183_p10 = scmp.lt.s32.totalorder (!%p144_p9), %s395_s21, 4 }
   0xf   : > { %s175_s30 = sand.u32 (!%p144_p9), 1, %s514_s10   ;;  %s403_s4 = sshll.u32 (!%p144_p9), %s564_s13, 7 }
  0x10   : > { %s394_s3 = sshll.u32 (!%p144_p9), %s175_s30, 3  ;;  %s632_s17 = scalar_lea.hbm (!%p144_p9), %s669_s2, %s403_s4 }
  0x11   : > { %s177_s6 = scalar_lea.vmem (!%p144_p9), [#allocation2], %s394_s3  ;;  %s306_s13 = scalar_lea.sflag (!%p144_p9), [#allocation3], %s175_s30 }
  0x12   : > { %s319_s7 = sshll.u32 (!%p144_p9), %s177_s6, 4  ;;  %s320_s7 = int_to_ptr.vmem [resolvable:$true] %s319_s7 }
  0x13   : > { %v210_v0 = vlaneseq  ;;  %v214_v1 = vstv %s399_s22  ;;  %v524_v2 = vmov 0   ;;  %s681_s21 = smov (!%p183_p10, %s395_s21), 4  ;;  %v525_v24 = vmov 0.00078125   ;;  %s527_s22 = smov [#allocation2]  }
  0x14   : > { %452 = vset.pattern.permute.xlu1 %v524_v2  ;;  %453 = vset.pattern.permute.xlu0 %v524_v2  ;;  %s396_s23 = sshll.u32 %s681_s21, 3  ;;  %vm269_vm8 = vcmask 7168   ;;  %v526_v31 = vmov 0.0   ;;  %s462_s21 = scalar_lea.vmem %s320_s7, 128 }
  0x15   : > { %v593_v3 = vshrl.u32 %v210_v0, 7  ;;  %s186_s26 = scalar_lea.vmem %s667_s0, %s396_s23  ;;  %s200_s29 = scalar_lea.vmem %s668_s1, %s396_s23  ;;  %v244_v21 = vand.u32 127, %v210_v0 }
  0x16   : > { %v206_v7 = vld [vmem:[%s186_s26] sm:$0xff]  ;;  %v207_v8 = vld [vmem:[%s186_s26 + $0x8] sm:$0xff]  ;;  %p463_p11 = scmp.ne.s32.totalorder %s320_s7, %s462_s21  ;;  %s466_s23 = sshll.u32 %s527_s22, 4  ;;  %s467_s23 = int_to_ptr.vmem [resolvable:$false] %s466_s23 }
  0x17   : > { %v215_v4 = vadd.s32 %v214_v1, %v593_v3  ;;  %v212_v5 = vadd.s32 8, %v593_v3  ;;  %v208_v9 = vld [vmem:[%s200_s29] sm:$0xff]  ;;  %v209_v12 = vld [vmem:[%s200_s29 + $0x8] sm:$0xff]  ;;  %vm299_vm9 = vcmp.eq.s32.totalorder %v593_v3, 1  ;;  %vm298_vm10 = vcmp.eq.s32.totalorder %v593_v3, 0  ;;  %s468_s24 = scalar_lea.vmem %s467_s23, 256  ;;  %p469_p0 = scmp.lt.s32.totalorder %s320_s7, %s467_s23 }
  0x18   : > { %246 = vperm.xlu1 %452, %v208_v9   ;;  %vm263_vm2 = vcmp.ne.s32.totalorder %v208_v9, 4294967295  ;;  %vm264_vm6 = vcmp.ne.s32.totalorder %v209_v12, 4294967295  ;;  %p464_p12 = pnand %p463_p11, %p581_p5  ;;  %p470_p1 = scmp.lt.s32.totalorder %s468_s24, %s462_s21 }
  0x19   : > { %vm217_vm0 = vcmp.lt.s32.totalorder %v215_v4, 37  ;;  %v216_v6 = vadd.s32 %v214_v1, %v212_v5 }
  0x1a   : > { %v223_v10 = vsel %vm217_vm0, %v206_v7, 0.0  ;;  %vm603_vm3 = vmand %vm217_vm0, %vm263_vm2  ;;  %p465_p13 = pneg %p464_p12  ;;  %p471_p2 = por %p470_p1, %p469_p0 }
  0x1b   : > { %vm218_vm1 = vcmp.lt.s32.totalorder %v216_v6, 37  ;;  %225 = vmax.xlane.f32.xlu0 %v223_v10  ;;  %v400_v32 = vsel %vm603_vm3, 1.0, %v526_v31 }
  0x1c   : > { %v224_v13 = vsel %vm218_vm1, %v207_v8, 0.0  ;;  %249 = vperm.xlu1 %452, %v209_v12   ;;  %vm609_vm7 = vmand %vm218_vm1, %vm264_vm6  ;;  %v286_v34 = vsel %vm269_vm8, %v400_v32, 0.0  ;;  %p472_p3 = pnand %p471_p2, %p465_p13 }
  0x1d   : > { %v401_v33 = vsel %vm609_vm7, 1.0, %v526_v31 }
  0x1e   : > { %v287_v35 = vsel %vm269_vm8, %v401_v33, 0.0 }
  0x1f   : > { %227 = vmax.xlane.f32.xlu0 %v224_v13  ;;  %v288_v36 = vadd.f32 %v287_v35, %v286_v34 }
  0x93   : > { %v247_v20 = vpop.permute.xlu1 %246 }
  0x94   : > { %vm251_vm4 = vcmp.eq.s32.totalorder %v244_v21, %v247_v20 }
  0x95   : > { %v253_v25 = vsel %vm251_vm4, 0.9007813, %v525_v24 }
  0x97   : > { %v250_v22 = vpop.permute.xlu1 %249 }
  0x98   : > { %vm252_vm5 = vcmp.eq.s32.totalorder %v244_v21, %v250_v22 }
  0x99   : > { %v254_v28 = vsel %vm252_vm5, 0.9007813, %v525_v24 }
  0xa4   : > { %v226_v14 = vpop.xlane.xlu0 %225 }
  0xa5   : > { %v229_v15 = vsub.f32 %v223_v10, %v226_v14 }
  0xa7   : > { %v231_v16 = vmul.f32 1.442695, %v229_v15  ;;  %v255_v26 = vmul.f32 %v253_v25, %v229_v15 }
  0xa8   : > { %v228_v17 = vpop.xlane.xlu0 %227 }
  0xa9   : > { %454 = vpow2.f32 %v231_v16  ;;  %v230_v18 = vsub.f32 %v224_v13, %v228_v17 }
  0xab   : > { %v233_v19 = vmul.f32 1.442695, %v230_v18  ;;  %v256_v29 = vmul.f32 %v254_v28, %v230_v18 }
  0xad   : > { %456 = vpow2.f32 %v233_v19 }
  0xb6   : > { %v455_v23 = vpop.eup %454 }
  0xb7   : > { %235 = vadd.xlane.f32.xlu0 %v455_v23 }
  0xba   : > { %v457_v27 = vpop.eup %456 }
  0xbb   : > { %257 = vadd.xlane.f32.xlu0 %v255_v26  ;;  %237 = vadd.xlane.f32.xlu1 %v457_v27 }
  0xbf   : > { %259 = vadd.xlane.f32.xlu0 %v256_v29 }
 0x140   : > { %v236_v37 = vpop.xlane.xlu0 %235 }
 0x141   : > { %458 = vlog2.f32 %v236_v37 }
 0x144   : > { %v238_v38 = vpop.xlane.xlu1 %237  ;;  %v258_v40 = vpop.xlane.xlu0 %257 }
 0x145   : > { %460 = vlog2.f32 %v238_v38 }
 0x148   : > { %v260_v45 = vpop.xlane.xlu0 %259 }
 0x14e   : > { %v459_v39 = vpop.eup %458 }
 0x14f   : > { %v240_v41 = vmul.f32 0.6931472, %v459_v39 }
 0x151   : > { %v261_v42 = vsub.f32 %v240_v41, %v258_v40 }
 0x152   : > { %v461_v43 = vpop.eup %460 }
 0x153   : > { %v242_v44 = vmul.f32 0.6931472, %v461_v43  ;;  %v267_v46 = vsel %vm603_vm3, %v261_v42, 0.0 }
 0x154   : > { %v270_v49 = vsel %vm269_vm8, %v267_v46, 0.0 }
 0x155   : > { %v262_v47 = vsub.f32 %v242_v44, %v260_v45 }
 0x157   : > { %v268_v48 = vsel %vm609_vm7, %v262_v47, 0.0 }
 0x158   : > { %v271_v50 = vsel %vm269_vm8, %v268_v48, 0.0 }
 0x159   : > { %v272_v51 = vadd.f32 %v271_v50, %v270_v49 }
 0x15b   : > { %273 = vadd.xlane.f32.xlu0 %v272_v51 }
 0x15f   : > { %289 = vadd.xlane.f32.xlu0 %v288_v36 }
 0x1e4   : > { %v274_v52 = vpop.xlane.xlu0 %273 }
 0x1e5   : > { %v275_v53 = vrot.slane %v274_v52, 4 }
 0x1e7   : > { %v276_v54 = vadd.f32 %v275_v53, %v274_v52 }
 0x1e8   : > { %v290_v55 = vpop.xlane.xlu0 %289 }
 0x1e9   : > { %v277_v56 = vrot.slane %v276_v54, 2  ;;  %v291_v57 = vrot.slane %v290_v55, 4 }
 0x1eb   : > { %v292_v58 = vadd.f32 %v291_v57, %v290_v55  ;;  %v278_v59 = vadd.f32 %v277_v56, %v276_v54 }
 0x1ed   : > { %v293_v60 = vrot.slane %v292_v58, 2  ;;  %v279_v61 = vrot.slane %v278_v59, 1 }
 0x1ef   : > { %v294_v62 = vadd.f32 %v293_v60, %v292_v58  ;;  %v280_v63 = vadd.f32 %v279_v61, %v278_v59 }
 0x1f1   : > { %406 = vpush %v280_v63  ;;  %v295_v0 = vrot.slane %v294_v62, 1 }
 0x1f3   : > { %v296_v1 = vadd.f32 %v295_v0, %v294_v62 }
 0x1f5   : > { %408 = vpush %v296_v1 }
 0x222   : > { %s407_s5 = spop %406 }
 0x223   : > { %v302_v4 = vstv %s407_s5 }
 0x226   : > { %s409_s8 = spop %408 }
 0x227   : > { %v300_v2 = vstv %s409_s8 }
 0x228   : > { %v301_v5 = vsel %vm299_vm9, %v300_v2, 0.0 }
 0x229   : > { %v303_v6 = vsel %vm298_vm10, %v302_v4, %v301_v5 }
 0x22a   : > { %304 = vst [vmem:[%s177_s6] sm:$0xff] %v303_v6 }
 0x22b   : > { %475 = shalt.err (!%p472_p3)
}
 0x22c   : > { %s476_s25 = scalar_lea.hbm %s632_s17, 128  ;;  %s480_s28 = scalar_lea.hbm %s669_s2, 384 }
 0x22d   : > { %p477_p4 = scmp.ne.s32.totalorder %s632_s17, %s476_s25  ;;  %p481_p9 = scmp.lt.s32.totalorder %s632_s17, %s669_s2 }
 0x22e   : > { %p482_p10 = scmp.lt.s32.totalorder %s480_s28, %s476_s25 }
 0x22f   : > { %p478_p7 = pnand %p477_p4, %p581_p5 }
 0x230   : > { %p483_p11 = por %p482_p10, %p481_p9 }
 0x231   : > { %p479_p8 = pneg %p478_p7 }
 0x233   : > { %p484_p12 = pnand %p483_p11, %p479_p8 }
 0x235   : > { %487 = shalt.err (!%p484_p12)
}
 0x236   : > { %410 = dma.vmem_to_hbm [thread:$0]  (%p581_p5), %s320_s7, 128, %s632_s17, %s306_s13  }
 0x237 PF: > { %p416_p13 = scmp.ge.s32.totalorder %s522_s12, 2  ;;  %s331_s3 = sand.u32 1, %s510_s9  }
 0x238   : > { %s332_s4 = scalar_lea.sflag [#allocation3], %s331_s3 }
 0x239   : > { %p413_p0 = pnand %p416_p13, %p585_p6 }
 0x23b   : > { %p414_p1 = pneg %p413_p0 }
 0x23d   : > { %505 = dma.done.wait (%p414_p1), %s332_s4, 128  }
 0x23e   : > { %507 = vsyncadd (%p414_p1), %s332_s4, 4294967168  ;;  %p12_p2 = scmp.ge.s32.totalorder %s568_s15, 5   ;;  %s676_s9 = smov %s514_s10 }
 0x23f   : > { %s677_s10 = smov %s518_s11  ;;  %s678_s11 = smov %s579_s18 }
 0x240   : > { %s679_s12 = smov %s568_s15  ;;  %14 = sbr.rel (!%p12_p2) target bundleno = 3 (0x3), region = 66 }
 0x245   :  { %337 = vsyncpa [#allocation3], 1 }
 0x246   :  { %339 = vsyncpa [#allocation3 + $0x1], 1 }

</bundles_post_ra>
